<compile_context>
chip_gen: v7x
topology: tpu7x:2x2x1
jax: 0.10.0
libtpu: 0.0.40
codegen_flags: <defaults>
</compile_context>

<pallas_src>
import functools
import math

import jax
import jax.numpy as jnp
from jax import lax
from jax.experimental import pallas as pl
from jax.experimental.pallas import tpu as pltpu

EPS = 1e-5  # PyTorch nn.LayerNorm default


# ---------------------------------------------------------------------------
# Kernel bodies
# ---------------------------------------------------------------------------
def _ln_affine_packed(x, lnw, lnb, seg, segT, inv_d):
    """x: (TR, k*D) f32 with k original rows packed per 128-lane row.

    seg:  (k*D, k) 0/1 segment indicator -> per-segment sums on the MXU.
    segT: (k, k*D) its transpose         -> broadcast stats back to lanes.
    """
    s1 = jnp.dot(x, seg, preferred_element_type=jnp.float32) * inv_d       # E[x]
    s2 = jnp.dot(x * x, seg, preferred_element_type=jnp.float32) * inv_d   # E[x^2]
    var = jnp.maximum(s2 - s1 * s1, 0.0)
    inv = lax.rsqrt(var + EPS)                                             # (TR, k)
    mean_b = jnp.dot(s1, segT, preferred_element_type=jnp.float32)         # (TR, k*D)
    inv_b = jnp.dot(inv, segT, preferred_element_type=jnp.float32)         # (TR, k*D)
    return (x - mean_b) * inv_b * lnw + lnb


def _ln_affine_plain(x, lnw, lnb):
    """x: (TR, D) f32, plain full-row LayerNorm (D >= 128 or unpackable)."""
    mean = jnp.mean(x, axis=-1, keepdims=True)
    msq = jnp.mean(x * x, axis=-1, keepdims=True)
    var = jnp.maximum(msq - mean * mean, 0.0)
    inv = lax.rsqrt(var + EPS)
    return (x - mean) * inv * lnw + lnb


def _sln_kernel_w_packed(hl_ref, w_ref, lnw_ref, lnb_ref, seg_ref, segT_ref,
                         o_ref, *, inv_d):
    x = hl_ref[...].astype(jnp.float32)
    y = _ln_affine_packed(x, lnw_ref[...], lnb_ref[...], seg_ref[...],
                          segT_ref[...], inv_d)
    # TODO(synk): on v6e/v7x the final multiply could stay in bf16 to shrink
    # f32 temporaries further (v5e has no bf16 VALU, so keep f32 here).
    o_ref[...] = (w_ref[...].astype(jnp.float32) * y).astype(o_ref.dtype)


def _sln_kernel_w_plain(hl_ref, w_ref, lnw_ref, lnb_ref, o_ref, *, inv_d):
    del inv_d
    x = hl_ref[...].astype(jnp.float32)
    y = _ln_affine_plain(x, lnw_ref[...], lnb_ref[...])
    o_ref[...] = (w_ref[...].astype(jnp.float32) * y).astype(o_ref.dtype)


def _sln_kernel_packed(hl_ref, lnw_ref, lnb_ref, seg_ref, segT_ref, o_ref, *,
                       inv_d):
    # Broadcast-only w has been folded into lnw / lnb by the wrapper.
    x = hl_ref[...].astype(jnp.float32)
    o_ref[...] = _ln_affine_packed(x, lnw_ref[...], lnb_ref[...], seg_ref[...],
                                   segT_ref[...], inv_d).astype(o_ref.dtype)


def _sln_kernel_plain(hl_ref, lnw_ref, lnb_ref, o_ref, *, inv_d):
    del inv_d
    x = hl_ref[...].astype(jnp.float32)
    o_ref[...] = _ln_affine_plain(x, lnw_ref[...], lnb_ref[...]).astype(o_ref.dtype)


# ---------------------------------------------------------------------------
# Hardware queries & tiling policy
# ---------------------------------------------------------------------------
def _vmem_capacity_bytes():
    """Physical VMEM per TensorCore; conservative fallback if unavailable."""
    try:
        info = pltpu.get_tpu_info()
        cap = getattr(info, "vmem_capacity_bytes", None)
        if isinstance(cap, int) and cap > 0:
            return cap
    except Exception:
        pass
    return 64 << 20  # smallest (v7x-class) assumption


def _num_tensorcores():
    """TensorCores fed by one kernel launch (v7x / megacore parts -> 2)."""
    try:
        info = pltpu.get_tpu_info()
        for attr in ("num_tensorcores", "tensorcores_per_chip", "num_cores"):
            v = getattr(info, attr, None)
            if isinstance(v, int) and v > 0:
                return v
    except Exception:
        pass
    try:
        kind = jax.devices()[0].device_kind.lower()
        if any(t in kind for t in ("v4", "v5p", "v7")):
            return 2
    except Exception:
        pass
    return 1  # v5e / v6e: single TensorCore -> no multi-step clamp


def _sublane_pack(dtype):
    return max(8, 32 // jnp.dtype(dtype).itemsize)


def _max_tile_rows(packed_d, dtype, n_tiled):
    """Largest row tile that fits the VMEM budget and the per-tile byte cap."""
    itemsize = jnp.dtype(dtype).itemsize
    pack = _sublane_pack(dtype)
    vmem = _vmem_capacity_bytes()
    # Per tile row: double-buffered native-dtype I/O tiles plus ~4 f32
    # temporaries (x, x*x, mean_b/inv_b, normed) live inside the kernel.
    per_row = n_tiled * 2 * packed_d * itemsize + 4 * packed_d * 4
    rows_vmem = int(vmem * 0.6) // per_row
    # ~4 MiB per input tile: big enough to amortize the ~0.35us per-grid-step
    # overhead and reach the HBM roofline, small enough for headroom.
    rows_cap = (4 << 20) // (packed_d * itemsize)
    rows = max(pack, min(rows_vmem, rows_cap))
    return (rows // pack) * pack


def _choose_tiling(packed_rows, max_rows, pack, num_tc):
    """-> (tile_rows, grid_steps, pad_rows).  Prefers divisors (no padding)."""
    if packed_rows <= max_rows:
        # Fits in one step.  On multi-TC parts, prefer a few balanced
        # parallel steps so both TensorCores stay fed.
        if num_tc > 1:
            for steps in (4 * num_tc, 2 * num_tc, num_tc):
                if packed_rows % steps == 0:
                    tile = packed_rows // steps
                    if tile >= pack and tile % pack == 0:
                        return tile, steps, 0
        return packed_rows, 1, 0

    # Largest pack-aligned divisor of packed_rows that fits in max_rows,
    # preferring a step count that is a multiple of num_tc (balanced).
    start = (max_rows // pack) * pack
    fallback = None
    for tile in range(start, pack - 1, -pack):
        if packed_rows % tile == 0:
            steps = packed_rows // tile
            if steps % num_tc == 0:
                return tile, steps, 0
            if fallback is None:
                fallback = (tile, steps)
    if fallback is not None:
        return fallback[0], fallback[1], 0

    # No clean divisor (rare): fall back to padding the row axis.
    # TODO(synk): replace with in-kernel tail masking via a scalar-prefetch
    # num_valid_rows instead of padding (avoids the extra HBM pass).
    tile = start
    steps = pl.cdiv(packed_rows, tile)
    return tile, steps, steps * tile - packed_rows


# ---------------------------------------------------------------------------
# Public entry point
# ---------------------------------------------------------------------------
@functools.partial(jax.jit, static_argnames=("row_tile",))
def sln_forward(hl, w, ln_weight, ln_bias, gamma, beta, *, row_tile=None):
    *lead, D = hl.shape
    rows = math.prod(lead) if lead else 1
    out_shape = hl.shape

    if jnp.broadcast_shapes(w.shape, hl.shape) != hl.shape:
        raise ValueError("w must broadcast to hl's shape")

    # Fold scalar gamma / beta into the LayerNorm affine once:
    #   out = w * (x_hat * (gamma*lnw) + (gamma*lnb + beta))
    g = gamma.reshape(()).astype(jnp.float32)
    b = beta.reshape(()).astype(jnp.float32)
    slnw = g * ln_weight.astype(jnp.float32).reshape(D)
    slnb = g * ln_bias.astype(jnp.float32).reshape(D) + b

    # w that only varies over the feature dim (or is a scalar) is folded into
    # the affine as well -> no per-row w tensor is read at all.
    feature_only_w = (w.ndim == 0) or all(s == 1 for s in w.shape[:-1])
    if feature_only_w:
        wv = w.astype(jnp.float32).reshape(-1)  # size 1 or D
        slnw = slnw * wv
        slnb = slnb * wv
        has_w, w2 = False, None
    elif w.shape == hl.shape:
        has_w, w2 = True, w.reshape(rows, D)
    else:
        # TODO(synk): read per-row w (e.g. (B,S,1)) at its true size via its
        # own BlockSpec instead of materializing the broadcast in HBM.
        has_w, w2 = True, jnp.broadcast_to(w, hl.shape).reshape(rows, D)

    hl2 = hl.reshape(rows, D)

    # Lane packing: present a 128-lane-dense last dim to Pallas when D < 128.
    k = 1
    if D < 128 and 128 % D == 0 and rows % (128 // D) == 0:
        k = 128 // D
    packed_rows = rows // k
    KD = k * D

    hl2 = hl2.reshape(packed_rows, KD)
    if has_w:
        w2 = w2.reshape(packed_rows, KD)
    lnw2 = jnp.tile(slnw, k).reshape(1, KD)
    lnb2 = jnp.tile(slnb, k).reshape(1, KD)

    pack = _sublane_pack(hl.dtype)
    num_tc = _num_tensorcores()
    n_tiled = 3 if has_w else 2
    if row_tile is None:
        max_rows = _max_tile_rows(KD, hl.dtype, n_tiled)
    else:
        # Validate / round a user-supplied static tile to the sublane pack.
        max_rows = max(pack, (int(row_tile) // pack) * pack)

    tile, steps, pad_rows = _choose_tiling(packed_rows, max_rows, pack, num_tc)
    if pad_rows:
        hl2 = jnp.pad(hl2, ((0, pad_rows), (0, 0)))
        if has_w:
            w2 = jnp.pad(w2, ((0, pad_rows), (0, 0)))

    row_map = lambda i: (i, 0)
    const_map = lambda i: (0, 0)

    in_specs = [pl.BlockSpec((tile, KD), row_map)]
    args = [hl2]
    if has_w:
        in_specs.append(pl.BlockSpec((tile, KD), row_map))
        args.append(w2)
    in_specs += [pl.BlockSpec((1, KD), const_map),
                 pl.BlockSpec((1, KD), const_map)]
    args += [lnw2, lnb2]

    if k > 1:
        # 0/1 segment-indicator matrices for the in-kernel MXU segment sums
        # and the broadcast of the per-segment stats back to lanes.
        seg = (jnp.arange(KD)[:, None] // D
               == jnp.arange(k)[None, :]).astype(jnp.float32)        # (KD, k)
        segT = seg.T                                                   # (k, KD)
        in_specs += [pl.BlockSpec((KD, k), const_map),
                     pl.BlockSpec((k, KD), const_map)]
        args += [seg, segT]
        kernel = _sln_kernel_w_packed if has_w else _sln_kernel_packed
    else:
        kernel = _sln_kernel_w_plain if has_w else _sln_kernel_plain

    out2 = pl.pallas_call(
        functools.partial(kernel, inv_d=1.0 / D),
        out_shape=jax.ShapeDtypeStruct((packed_rows + pad_rows, KD), hl.dtype),
        grid_spec=pltpu.PrefetchScalarGridSpec(
            num_scalar_prefetch=0,
            grid=(steps,),
            in_specs=in_specs,
            out_specs=pl.BlockSpec((tile, KD), row_map),
        ),
        compiler_params=pltpu.CompilerParams(
            dimension_semantics=("parallel",),
            vmem_limit_bytes=int(_vmem_capacity_bytes() * 0.75),
        ),
    )(*args)

    if pad_rows:
        out2 = out2[:packed_rows]
    return out2.reshape(out_shape)


# ---------------------------------------------------------------------------
# Reference + self-test
# ---------------------------------------------------------------------------
def sln_reference(hl, w, ln_weight, ln_bias, gamma, beta):
    x = hl.astype(jnp.float32)
    mean = jnp.mean(x, axis=-1, keepdims=True)
    var = jnp.mean((x - mean) ** 2, axis=-1, keepdims=True)
    normed = (x - mean) / jnp.sqrt(var + EPS) * ln_weight + ln_bias
    return gamma.reshape(()) * w * normed + beta.reshape(()) * w


if __name__ == "__main__":
    key = jax.random.PRNGKey(0)
    k_hl, k_w, k_g, k_b = jax.random.split(key, 4)

    B, S, D = 2, 8, 32  # batch, seq, num_features
    hl = jax.random.normal(k_hl, (B, S, D), dtype=jnp.float32)
    w = jax.random.normal(k_w, (B, S, D), dtype=jnp.float32)

    # nn.LayerNorm defaults + randn scalar modulation params.
    ln_weight = jnp.ones((D,), dtype=jnp.float32)
    ln_bias = jnp.zeros((D,), dtype=jnp.float32)
    gamma = jax.random.normal(k_g, (1, 1, 1), dtype=jnp.float32)
    beta = jax.random.normal(k_b, (1, 1, 1), dtype=jnp.float32)

    out = sln_forward(hl, w, ln_weight, ln_bias, gamma, beta)
    out = jax.block_until_ready(out)

    ref = sln_reference(hl, w, ln_weight, ln_bias, gamma, beta)
    assert out.shape == (B, S, D)
    max_err = float(jnp.max(jnp.abs(out - ref)))
    assert jnp.allclose(out, ref, atol=1e-4, rtol=1e-4), (
        f"mismatch vs reference (max abs err {max_err})")

    print("KERNEL_OK")
</pallas_src>

<mosaic_0001>
module attributes {stable_mosaic.version = 11 : i64} {
  func.func @_sln_kernel_w_packed(%arg0: i32, %arg1: memref<4x128xf32, #tpu.memory_space<vmem>>, %arg2: memref<4x128xf32, #tpu.memory_space<vmem>>, %arg3: memref<1x128xf32, #tpu.memory_space<vmem>>, %arg4: memref<1x128xf32, #tpu.memory_space<vmem>>, %arg5: memref<128x4xf32, #tpu.memory_space<vmem>>, %arg6: memref<4x128xf32, #tpu.memory_space<vmem>>, %arg7: memref<4x128xf32, #tpu.memory_space<vmem>>) attributes {dimension_semantics = [#tpu.dimension_semantics<parallel>], iteration_bounds = array<i64: 1>, scalar_prefetch = 0 : i64, scratch_operands = 0 : i64, tpu.core_type = #tpu.core_type<tc>, window_params = [{transform_indices = @transform_0, window_bounds = array<i64: 4, 128>}, {transform_indices = @transform_1, window_bounds = array<i64: 4, 128>}, {pipeline_mode = #tpu.pipeline_mode<synchronous>, transform_indices = @transform_2, window_bounds = array<i64: 1, 128>}, {pipeline_mode = #tpu.pipeline_mode<synchronous>, transform_indices = @transform_3, window_bounds = array<i64: 1, 128>}, {pipeline_mode = #tpu.pipeline_mode<synchronous>, transform_indices = @transform_4, window_bounds = array<i64: 128, 4>}, {pipeline_mode = #tpu.pipeline_mode<synchronous>, transform_indices = @transform_5, window_bounds = array<i64: 4, 128>}, {transform_indices = @transform_6, window_bounds = array<i64: 4, 128>}]} {
    %c0 = arith.constant 0 : index
    %c0_0 = arith.constant 0 : index
    %0 = vector.load %arg1[%c0, %c0_0] : memref<4x128xf32, #tpu.memory_space<vmem>>, vector<4x128xf32>
    %c0_1 = arith.constant 0 : index
    %c0_2 = arith.constant 0 : index
    %1 = vector.load %arg3[%c0_1, %c0_2] : memref<1x128xf32, #tpu.memory_space<vmem>>, vector<1x128xf32>
    %c0_3 = arith.constant 0 : index
    %c0_4 = arith.constant 0 : index
    %2 = vector.load %arg4[%c0_3, %c0_4] : memref<1x128xf32, #tpu.memory_space<vmem>>, vector<1x128xf32>
    %c0_5 = arith.constant 0 : index
    %c0_6 = arith.constant 0 : index
    %3 = vector.load %arg5[%c0_5, %c0_6] : memref<128x4xf32, #tpu.memory_space<vmem>>, vector<128x4xf32>
    %c0_7 = arith.constant 0 : index
    %c0_8 = arith.constant 0 : index
    %4 = vector.load %arg6[%c0_7, %c0_8] : memref<4x128xf32, #tpu.memory_space<vmem>>, vector<4x128xf32>
    %cst = arith.constant dense<0.000000e+00> : vector<4x4xf32>
    %5 = tpu.matmul %0, %3, %cst {dimension_numbers = #tpu.dot_dimension_numbers<[1], [0], [0], [1], [0, 0, 1, 1], [], []>} : vector<4x128xf32>, vector<128x4xf32>, vector<4x4xf32> -> vector<4x4xf32>
    %cst_9 = arith.constant 3.125000e-02 : f32
    %6 = vector.broadcast %cst_9 : f32 to vector<4x4xf32>
    %7 = arith.mulf %5, %6 : vector<4x4xf32>
    %8 = arith.mulf %0, %0 : vector<4x128xf32>
    %cst_10 = arith.constant dense<0.000000e+00> : vector<4x4xf32>
    %9 = tpu.matmul %8, %3, %cst_10 {dimension_numbers = #tpu.dot_dimension_numbers<[1], [0], [0], [1], [0, 0, 1, 1], [], []>} : vector<4x128xf32>, vector<128x4xf32>, vector<4x4xf32> -> vector<4x4xf32>
    %cst_11 = arith.constant 3.125000e-02 : f32
    %10 = vector.broadcast %cst_11 : f32 to vector<4x4xf32>
    %11 = arith.mulf %9, %10 : vector<4x4xf32>
    %12 = arith.mulf %7, %7 : vector<4x4xf32>
    %13 = arith.subf %11, %12 : vector<4x4xf32>
    %cst_12 = arith.constant 0.000000e+00 : f32
    %14 = vector.broadcast %cst_12 : f32 to vector<4x4xf32>
    %15 = arith.maximumf %13, %14 : vector<4x4xf32>
    %cst_13 = arith.constant 9.99999974E-6 : f32
    %16 = vector.broadcast %cst_13 : f32 to vector<4x4xf32>
    %17 = arith.addf %15, %16 : vector<4x4xf32>
    %18 = math.rsqrt %17 : vector<4x4xf32>
    %cst_14 = arith.constant dense<0.000000e+00> : vector<4x128xf32>
    %19 = tpu.matmul %7, %4, %cst_14 {dimension_numbers = #tpu.dot_dimension_numbers<[1], [0], [0], [1], [0, 0, 1, 1], [], []>} : vector<4x4xf32>, vector<4x128xf32>, vector<4x128xf32> -> vector<4x128xf32>
    %cst_15 = arith.constant dense<0.000000e+00> : vector<4x128xf32>
    %20 = tpu.matmul %18, %4, %cst_15 {dimension_numbers = #tpu.dot_dimension_numbers<[1], [0], [0], [1], [0, 0, 1, 1], [], []>} : vector<4x4xf32>, vector<4x128xf32>, vector<4x128xf32> -> vector<4x128xf32>
    %21 = arith.subf %0, %19 : vector<4x128xf32>
    %22 = arith.mulf %21, %20 : vector<4x128xf32>
    %23 = vector.broadcast %1 : vector<1x128xf32> to vector<4x128xf32>
    %24 = arith.mulf %22, %23 : vector<4x128xf32>
    %25 = vector.broadcast %2 : vector<1x128xf32> to vector<4x128xf32>
    %26 = arith.addf %24, %25 : vector<4x128xf32>
    %c0_16 = arith.constant 0 : index
    %c0_17 = arith.constant 0 : index
    %27 = vector.load %arg2[%c0_16, %c0_17] : memref<4x128xf32, #tpu.memory_space<vmem>>, vector<4x128xf32>
    %28 = arith.mulf %27, %26 : vector<4x128xf32>
    %c0_18 = arith.constant 0 : index
    %c0_19 = arith.constant 0 : index
    %29 = vector.load %arg7[%c0_18, %c0_19] : memref<4x128xf32, #tpu.memory_space<vmem>>, vector<4x128xf32>
    tpu.vector_store %arg7[%c0_18, %c0_19], %28 {strides = array<i32>} : memref<4x128xf32, #tpu.memory_space<vmem>>, vector<4x128xf32>,
    return
  }
  func.func @transform_0(%arg0: i32) -> (i32, i32) {
    %c0_i32 = arith.constant 0 : i32
    %c0_i32_0 = arith.constant 0 : i32
    return %arg0, %c0_i32 : i32, i32
  }
  func.func @transform_1(%arg0: i32) -> (i32, i32) {
    %c0_i32 = arith.constant 0 : i32
    %c0_i32_0 = arith.constant 0 : i32
    return %arg0, %c0_i32 : i32, i32
  }
  func.func @transform_2(%arg0: i32) -> (i32, i32) {
    %c0_i32 = arith.constant 0 : i32
    %c0_i32_0 = arith.constant 0 : i32
    %c0_i32_1 = arith.constant 0 : i32
    return %c0_i32, %c0_i32_0 : i32, i32
  }
  func.func @transform_3(%arg0: i32) -> (i32, i32) {
    %c0_i32 = arith.constant 0 : i32
    %c0_i32_0 = arith.constant 0 : i32
    %c0_i32_1 = arith.constant 0 : i32
    return %c0_i32, %c0_i32_0 : i32, i32
  }
  func.func @transform_4(%arg0: i32) -> (i32, i32) {
    %c0_i32 = arith.constant 0 : i32
    %c0_i32_0 = arith.constant 0 : i32
    %c0_i32_1 = arith.constant 0 : i32
    return %c0_i32, %c0_i32_0 : i32, i32
  }
  func.func @transform_5(%arg0: i32) -> (i32, i32) {
    %c0_i32 = arith.constant 0 : i32
    %c0_i32_0 = arith.constant 0 : i32
    %c0_i32_1 = arith.constant 0 : i32
    return %c0_i32, %c0_i32_0 : i32, i32
  }
  func.func @transform_6(%arg0: i32) -> (i32, i32) {
    %c0_i32 = arith.constant 0 : i32
    %c0_i32_0 = arith.constant 0 : i32
    return %arg0, %c0_i32 : i32, i32
  }
}

</mosaic_0001>

<bundles_post_ra>
// kernel: tile.18
= control target key start
LH: loop header
LB: loop body
LE: loop exit
PB: predicated region body
PF: predicated region fallthrough
CT: control target
= control target key end

     0   :  { %s22_s0 = inlined_call_operand.vmem [shape: f32[32], index: 0, kind: input, shape index: {}]   ;;  %s23_s1 = inlined_call_operand.vmem [shape: f32[4,32], index: 1, kind: output, shape index: {}]  }
   0x1   :  { %v4_v0 = vld [vmem:[%s22_s0] ss:$0 sm:$0xff] }
   0x2   :  { %5 = vst [vmem:[%s23_s1] sm:$0xf] %v4_v0 }

// kernel: tile.19
= control target key start
LH: loop header
LB: loop body
LE: loop exit
PB: predicated region body
PF: predicated region fallthrough
CT: control target
= control target key end

     0   :  { %vm7_vm0 = vcmask 261120   ;;  %s37_s8 = smov 32   ;;  %s38_s9 = smov 64   ;;  %vm13_vm1 = vcmask 1048320   ;;  %vm19_vm2 = vcmask 785920   ;;  %vm25_vm3 = vcmask 523520   ;;  %s55_s0 = inlined_call_operand.vmem [shape: f32[4,32], index: 0, kind: input, shape index: {}]   ;;  %s56_s1 = inlined_call_operand.vmem [shape: f32[1,128], index: 1, kind: output, shape index: {}]  }
   0x1   :  { %v4_v0 = vld [vmem:[%s55_s0] sm:$0xf]  ;;  %s36_s0 = smov 96  }
   0x2   :  { %5 = vst [vmem:[#allocation1] sm:$0xf] %v4_v0 }
   0x9   :  { %v10_v1 = vld [vmem:[#allocation1 + $0x3] sm:$0x1]   ;;  %v22_v2 = vld [vmem:[#allocation1 + $0x1] sm:$0x1]   ;;  %v6_v3 = vld [vmem:[#allocation1] sm:$0x1]  }
   0xa   :  { %11 = vrot.lane.b32.xlu0 %v10_v1, %s36_s0  ;;  %23 = vrot.lane.b32.xlu1 %v22_v2, %s37_s8  ;;  %v16_v4 = vld [vmem:[#allocation1 + $0x2] sm:$0x1]   ;;  %8 = vst.msk [vmem:[#allocation0] sm:$0x1] %vm7_vm0, %v6_v3  }
   0xe   :  { %17 = vrot.lane.b32.xlu0 %v16_v4, %s38_s9 }
  0x7c   :  { %v12_v5 = vpop.permute.xlu0 %11   ;;  %v24_v6 = vpop.permute.xlu1 %23  }
  0x7d   :  { %14 = vst.msk [vmem:[#allocation0] sm:$0x1] %vm13_vm1, %v12_v5  }
  0x80   :  { %v18_v7 = vpop.permute.xlu0 %17  }
  0x81   :  { %20 = vst.msk [vmem:[#allocation0] sm:$0x1] %vm19_vm2, %v18_v7  }
  0x82   :  { %26 = vst.msk [vmem:[#allocation0] sm:$0x1] %vm25_vm3, %v24_v6  }
  0x89   :  { %v30_v8 = vld [vmem:[#allocation0] sm:$0x1] }
  0x8a   :  { %32 = vst [vmem:[%s56_s1] sm:$0x1] %v30_v8 }

// kernel: sln_forward.1
= control target key start
LH: loop header
LB: loop body
LE: loop exit
PB: predicated region body
PF: predicated region fallthrough
CT: control target
= control target key end

     0   :  { %v542_v0 = vmov 0.0|0.0   ;;  %vm543_vm0 = vmmov 0   ;;  %v544_v6 = vmov 0.0   ;;  %vm195_vm1 = vcmask 1043456   ;;  %s650_s4 = inlined_call_operand.vmem [shape: f32[128,4], index: 4, kind: input, shape index: {}]   ;;  %s651_s0 = inlined_call_operand.vmem [shape: f32[4,128], index: 0, kind: input, shape index: {}]   ;;  %s652_s5 = inlined_call_operand.vmem [shape: f32[4,128], index: 5, kind: input, shape index: {}]   ;;  %s653_s2 = inlined_call_operand.vmem [shape: f32[1,128], index: 2, kind: input, shape index: {}]   ;;  %s654_s3 = inlined_call_operand.vmem [shape: f32[1,128], index: 3, kind: input, shape index: {}]   ;;  %s655_s1 = inlined_call_operand.vmem [shape: f32[4,128], index: 1, kind: input, shape index: {}]   ;;  %s656_s6 = inlined_call_operand.vmem [shape: f32[4,128], index: 6, kind: output, shape index: {}]  }
   0x1   :  { %489 = vmatprep.subr.bf16.mxu0 %v542_v0  ;;  %v26_v1 = vld [vmem:[%s650_s4] sm:$0xff]  ;;  %v27_v2 = vld [vmem:[%s650_s4 + $0x8] sm:$0xff]  ;;  %513 = vmatprep.subr.bf16.mxu1 %v542_v0  ;;  %v28_v3 = vld [vmem:[%s650_s4 + $0x10] sm:$0xff]  ;;  %vm191_vm2 = vcmask 31744  }
   0x2   :  { %v490_v4 = vpack.c.bf16 %v27_v2, %v26_v1  ;;  %v29_v5 = vld [vmem:[%s650_s4 + $0x18] sm:$0xff]  ;;  %441 = vmatprep.mubr.msk.f32.mxu0 %vm543_vm0, %v544_v6  ;;  %476 = vmatprep.mubr.msk.f32.mxu1 %vm543_vm0, %v544_v6  ;;  %v30_v8 = vld [vmem:[%s650_s4 + $0x20] sm:$0xff]  ;;  %v31_v9 = vld [vmem:[%s650_s4 + $0x28] sm:$0xff] }
   0x3   :  { %v493_v7 = vpack.c.bf16 %v29_v5, %v28_v3  ;;  %v496_v10 = vpack.c.bf16 %v31_v9, %v30_v8  ;;  %v32_v11 = vld [vmem:[%s650_s4 + $0x30] sm:$0xff]  ;;  %v33_v12 = vld [vmem:[%s650_s4 + $0x38] sm:$0xff]  ;;  %v34_v14 = vld [vmem:[%s650_s4 + $0x40] sm:$0xff] }
   0x4   :  { %491 = vmatpush3.bf16.msra.mxu0 %v490_v4  ;;  %515 = vmatpush3.bf16.msra.mxu1 %v490_v4  ;;  %v499_v13 = vpack.c.bf16 %v33_v12, %v32_v11  ;;  %v35_v15 = vld [vmem:[%s650_s4 + $0x48] sm:$0xff]  ;;  %v36_v17 = vld [vmem:[%s650_s4 + $0x50] sm:$0xff]  ;;  %v37_v18 = vld [vmem:[%s650_s4 + $0x58] sm:$0xff] }
   0x5   :  { %492 = vmatprep.subr.bf16.mxu0 %v542_v0  ;;  %516 = vmatprep.subr.bf16.mxu1 %v542_v0  ;;  %v502_v16 = vpack.c.bf16 %v35_v15, %v34_v14  ;;  %v505_v19 = vpack.c.bf16 %v37_v18, %v36_v17  ;;  %v38_v20 = vld [vmem:[%s650_s4 + $0x60] sm:$0xff]  ;;  %v39_v21 = vld [vmem:[%s650_s4 + $0x68] sm:$0xff]  ;;  %v40_v23 = vld [vmem:[%s650_s4 + $0x70] sm:$0xff] }
   0x6   :  { %v508_v22 = vpack.c.bf16 %v39_v21, %v38_v20  ;;  %v41_v24 = vld [vmem:[%s650_s4 + $0x78] sm:$0xff]  ;;  %v23_v26 = vld [vmem:[%s651_s0] sm:$0xf] }
   0x7   :  { %v511_v25 = vpack.c.bf16 %v41_v24, %v40_v23  ;;  %v114_v27 = vmul.f32 %v23_v26, %v23_v26  ;;  %v42_v28 = vld [vmem:[%s652_s5] sm:$0xf] }
   0x8   :  { %494 = vmatpush3.bf16.msra.mxu0 %v493_v7  ;;  %518 = vmatpush3.bf16.msra.mxu1 %v493_v7  ;;  %v369_v43 = vld [vmem:[%s653_s2] ss:$0 sm:$0xff] }
   0x9   :  { %495 = vmatprep.subr.bf16.mxu0 %v542_v0  ;;  %519 = vmatprep.subr.bf16.mxu1 %v542_v0  ;;  %v370_v47 = vld [vmem:[%s654_s3] ss:$0 sm:$0xff] }
   0xa   :  { %v358_v49 = vld [vmem:[%s655_s1] sm:$0xf] }
   0xc   :  { %497 = vmatpush3.bf16.msra.mxu0 %v496_v10  ;;  %521 = vmatpush3.bf16.msra.mxu1 %v496_v10 }
   0xd   :  { %498 = vmatprep.subr.bf16.mxu0 %v542_v0  ;;  %522 = vmatprep.subr.bf16.mxu1 %v542_v0 }
  0x10   :  { %500 = vmatpush3.bf16.msra.mxu0 %v499_v13  ;;  %524 = vmatpush3.bf16.msra.mxu1 %v499_v13 }
  0x11   :  { %501 = vmatprep.subr.bf16.mxu0 %v542_v0  ;;  %525 = vmatprep.subr.bf16.mxu1 %v542_v0 }
  0x14   :  { %503 = vmatpush3.bf16.msra.mxu0 %v502_v16  ;;  %527 = vmatpush3.bf16.msra.mxu1 %v502_v16 }
  0x15   :  { %504 = vmatprep.subr.bf16.mxu0 %v542_v0  ;;  %528 = vmatprep.subr.bf16.mxu1 %v542_v0 }
  0x18   :  { %506 = vmatpush3.bf16.msra.mxu0 %v505_v19  ;;  %530 = vmatpush3.bf16.msra.mxu1 %v505_v19 }
  0x19   :  { %507 = vmatprep.subr.bf16.mxu0 %v542_v0  ;;  %531 = vmatprep.subr.bf16.mxu1 %v542_v0 }
  0x1c   :  { %509 = vmatpush3.bf16.msra.mxu0 %v508_v22  ;;  %533 = vmatpush3.bf16.msra.mxu1 %v508_v22 }
  0x1d   :  { %510 = vmatprep.subr.bf16.mxu0 %v542_v0  ;;  %534 = vmatprep.subr.bf16.mxu1 %v542_v0 }
  0x20   :  { %512 = vmatpush3.bf16.msra.mxu0 %v511_v25  ;;  %536 = vmatpush3.bf16.msra.mxu1 %v511_v25 }
  0x21   :  { %479 = vmatprep.subr.mxu0 %v544_v6  ;;  %484 = vmatprep.subr.mxu1 %v544_v6 }
  0x23   :  { %442 = vmatmul.mubr.f32.vlgmr.msra.gmra.mrb[0].mxu0 %v23_v26  ;;  %477 = vmatmul.mubr.f32.vlgmr.msra.gmra.mrb[0].mxu1 %v114_v27 }
  0x24   :  { %481 = vmatprep.mubr.msk.f32.mxu0 %vm543_vm0, %v544_v6  ;;  %486 = vmatprep.mubr.msk.f32.mxu1 %vm543_vm0, %v544_v6 }
  0x25   :  { %480 = vmatpush3.msk.msra.mxu0 %vm195_vm1, %v42_v28  ;;  %485 = vmatpush3.msk.msra.mxu1 %vm195_vm1, %v42_v28 }
  0xf6   :  { %v109_v29 = vpop.f32.mrb[0].mxu0  ;;  %v181_v30 = vpop.f32.mrb[0].mxu1 }
  0xf7   :  { %v113_v31 = vmul.f32 0.03125, %v109_v29  ;;  %v443_v32 = vpop.f32.mrb[1].mxu0  ;;  %v185_v33 = vmul.f32 0.03125, %v181_v30  ;;  %v478_v34 = vpop.f32.mrb[1].mxu1 }
  0xf9   :  { %v186_v35 = vmul.f32 %v113_v31, %v113_v31  ;;  %482 = vmatmul.mubr.msk.f32.vlgmr.msra.gmra.mrb[2].mxu0 %vm191_vm2, %v113_v31 }
  0xfb   :  { %v187_v36 = vsub.f32 %v185_v33, %v186_v35 }
  0xfd   :  { %v188_v37 = vmax.f32 %v187_v36, 0.0 }
  0xff   :  { %v189_v38 = vadd.f32 1e-05, %v188_v37 }
 0x101   :  { %540 = vrsqrt.f32 %v189_v38 }
 0x10b   :  { %v541_v39 = vpop.eup %540 }
 0x10c   :  { %487 = vmatmul.mubr.msk.f32.vlgmr.msra.gmra.mrb[2].mxu1 %vm191_vm2, %v541_v39 }
 0x1cc   :  { %v265_v40 = vpop.f32.mrb[2].mxu0 }
 0x1cd   :  { %v483_v41 = vpop.f32.mrb[3].mxu0  ;;  %v342_v42 = vsub.f32 %v23_v26, %v265_v40 }
 0x1df   :  { %v338_v44 = vpop.f32.mrb[2].mxu1 }
 0x1e0   :  { %v343_v45 = vmul.f32 %v342_v42, %v338_v44  ;;  %v488_v46 = vpop.f32.mrb[3].mxu1 }
 0x1e2   :  { %v350_v48 = vmul.f32 %v369_v43, %v343_v45 }
 0x1e4   :  { %v357_v50 = vadd.f32 %v370_v47, %v350_v48 }
 0x1e6   :  { %v359_v51 = vmul.f32 %v358_v49, %v357_v50 }
 0x1e8   :  { %360 = vst [vmem:[%s656_s6] sm:$0xf] %v359_v51 }

</bundles_post_ra>
